<compile_context>
chip_gen: v7x
topology: tpu7x:2x2x1
jax: 0.10.0
libtpu: 0.0.40
codegen_flags: <defaults>
</compile_context>

<pallas_src>
import jax
import jax.numpy as jnp
from jax import lax
from jax.experimental import pallas as pl
from jax.experimental.pallas import tpu as pltpu

_LANE = 128


def _round_up(a, b):
    return (a + b - 1) // b * b


def _make_dice_partials_kernel(N, M, TN, TM, C, needs_n_mask, needs_m_mask):
    groups = TM // _LANE

    def kernel(x_ref, y_ref, num_ref, sxx_ref, syy_ref):
        # x_ref/y_ref: (TN, C, TM) tiles; outputs: (1, C, 128) f32 partials that
        # accumulate over the (sequential) sample-block axis m.
        n = pl.program_id(0)
        m = pl.program_id(1)

        @pl.when(m == 0)
        def _init():
            num_ref[...] = jnp.zeros_like(num_ref)
            sxx_ref[...] = jnp.zeros_like(sxx_ref)
            syy_ref[...] = jnp.zeros_like(syy_ref)

        if needs_m_mask:
            valid_m = M - m * TM
            lane = lax.broadcasted_iota(jnp.int32, (TN, C, _LANE), 2)
        if needs_n_mask:
            row_keep = (lax.broadcasted_iota(jnp.int32, (TN, C, _LANE), 0)
                        < (N - n * TN))

        num = jnp.zeros((1, C, _LANE), jnp.float32)
        sxx = jnp.zeros((1, C, _LANE), jnp.float32)
        syy = jnp.zeros((1, C, _LANE), jnp.float32)
        # Static, bounded unroll over 128-wide lane groups of the tile: keeps
        # per-group temporaries small and the partials register-resident.
        for g in range(groups):
            xs = x_ref[:, :, g * _LANE:(g + 1) * _LANE].astype(jnp.float32)
            ys = y_ref[:, :, g * _LANE:(g + 1) * _LANE].astype(jnp.float32)
            if needs_m_mask:
                keep = (lane + g * _LANE) < valid_m
                xs = jnp.where(keep, xs, 0.0)
                ys = jnp.where(keep, ys, 0.0)
            if needs_n_mask:
                xs = jnp.where(row_keep, xs, 0.0)
                ys = jnp.where(row_keep, ys, 0.0)
            num = num + jnp.sum(xs * ys, axis=0, keepdims=True)
            sxx = sxx + jnp.sum(xs * xs, axis=0, keepdims=True)
            syy = syy + jnp.sum(ys * ys, axis=0, keepdims=True)

        # One small lane-dense RMW per product per grid step.
        num_ref[...] += num
        sxx_ref[...] += sxx
        syy_ref[...] += syy

    return kernel


def sorensen_dice_loss(input_, target, *, eps=1e-6, channelwise=True,
                       weight=None, target_tile_bytes=2 * 1024 * 1024,
                       tm_cap=4096):
    """Scalar Sorensen-Dice loss matching inferno's SorensenDiceLoss.forward."""
    assert input_.shape == target.shape
    assert input_.ndim >= 2

    N, C = int(input_.shape[0]), int(input_.shape[1])
    M = 1
    for d in input_.shape[2:]:
        M *= int(d)
    M = max(M, 1)

    # Free view of the contiguous (N, C, ...) layout -- no transpose, no copy.
    x3 = input_.reshape(N, C, M)
    y3 = target.reshape(N, C, M)

    # Only tiny inputs (sample axis shorter than one lane group) are padded;
    # everything else is handled with in-kernel masks (no HBM copy).
    if M < _LANE:
        x3 = jnp.pad(x3, ((0, 0), (0, 0), (0, _LANE - M)))
        y3 = jnp.pad(y3, ((0, 0), (0, 0), (0, _LANE - M)))
        M = _LANE

    itemsize = jnp.dtype(input_.dtype).itemsize
    tile_elems = max(target_tile_bytes // itemsize, C * _LANE)

    # Sample-block TM: as long a 128-multiple as the budget, the unroll cap and
    # M itself allow (never rounded above M -> ragged tail is masked, not read).
    tm_budget = max(_LANE, (tile_elems // C) // _LANE * _LANE)
    TM = max(_LANE, min(tm_cap, tm_budget, (M // _LANE) * _LANE))
    # Batch-block TN fills the remaining tile budget, capped so the per-group
    # working set (TN*C*128 f32) stays modest.
    TN = max(1, min(N, tile_elems // (C * TM), max(1, 1024 // C)))

    GN = pl.cdiv(N, TN)
    GM = pl.cdiv(M, TM)
    needs_n_mask = (N % TN) != 0
    needs_m_mask = (M % TM) != 0

    kernel = _make_dice_partials_kernel(N, M, TN, TM, C,
                                        needs_n_mask, needs_m_mask)

    part_shape = jax.ShapeDtypeStruct((GN, C, _LANE), jnp.float32)
    part_spec = pl.BlockSpec((1, C, _LANE), lambda n, m: (n, 0, 0))
    in_spec = pl.BlockSpec((TN, C, TM), lambda n, m: (n, 0, m))

    cost = pl.CostEstimate(
        flops=6 * N * C * M,
        transcendentals=0,
        bytes_accessed=2 * N * C * M * itemsize + 3 * GN * C * _LANE * 4)

    num_p, sxx_p, syy_p = pl.pallas_call(
        kernel,
        out_shape=(part_shape, part_shape, part_shape),
        grid=(GN, GM),
        in_specs=[in_spec, in_spec],
        out_specs=[part_spec, part_spec, part_spec],
        compiler_params=pltpu.CompilerParams(
            # Batch-block axis is independent (lets v7x shard across its 2 TCs);
            # the sample axis carries the accumulation and stays sequential.
            dimension_semantics=("parallel", "arbitrary"),
            vmem_limit_bytes=32 * 1024 * 1024),
        cost_estimate=cost,
    )(x3, y3)

    # Tiny finalize in plain JAX: fold batch blocks + lanes, clamp, divide.
    num = jnp.sum(num_p, axis=(0, 2))                                   # (C,)
    den = jnp.sum(sxx_p, axis=(0, 2)) + jnp.sum(syy_p, axis=(0, 2))     # (C,)
    if channelwise:
        cw = -2.0 * num / jnp.maximum(den, eps)
        if weight is not None:
            cw = jnp.asarray(weight, cw.dtype) * cw
        return jnp.sum(cw)
    # non-channelwise: joint num/den; weight is ignored (matches PyTorch).
    return -2.0 * jnp.sum(num) / jnp.maximum(jnp.sum(den), eps)


def _reference_dice(x, y, eps=1e-6, channelwise=True, weight=None):
    """Pure-JAX reimplementation of the PyTorch forward (reference)."""
    C = x.shape[1]
    if not channelwise:
        num = jnp.sum(x * y)
        den = jnp.sum(x * x) + jnp.sum(y * y)
        return -2.0 * num / jnp.maximum(den, eps)
    xf = jnp.moveaxis(x, 1, 0).reshape(C, -1)
    yf = jnp.moveaxis(y, 1, 0).reshape(C, -1)
    num = jnp.sum(xf * yf, axis=-1)
    den = jnp.sum(xf * xf, axis=-1) + jnp.sum(yf * yf, axis=-1)
    cw = -2.0 * num / jnp.maximum(den, eps)
    if weight is not None:
        cw = weight * cw
    return jnp.sum(cw)


if __name__ == "__main__":
    key = jax.random.PRNGKey(0)
    kx, ky, kx2, ky2 = jax.random.split(key, 4)

    # Primary case: SorensenDiceLoss()(input, target), (N, C, H, W) = (2, 4, 16, 16)
    N, C, H, W = 2, 4, 16, 16
    x = jax.random.uniform(kx, (N, C, H, W), dtype=jnp.float32)
    y = (jax.random.uniform(ky, (N, C, H, W)) > 0.5).astype(jnp.float32)

    loss = jax.block_until_ready(sorensen_dice_loss(x, y))
    ref = _reference_dice(x, y)
    assert loss.shape == ()
    assert jnp.allclose(loss, ref, rtol=1e-5, atol=1e-6), (loss, ref)

    # Class weights (channelwise) and joint (channelwise=False) variants.
    w = jnp.array([0.1, 0.4, 0.2, 0.3], jnp.float32)
    loss_w = jax.block_until_ready(sorensen_dice_loss(x, y, weight=w))
    assert jnp.allclose(loss_w, _reference_dice(x, y, weight=w),
                        rtol=1e-5, atol=1e-6)

    loss_j = jax.block_until_ready(sorensen_dice_loss(x, y, channelwise=False))
    assert jnp.allclose(loss_j, _reference_dice(x, y, channelwise=False),
                        rtol=1e-5, atol=1e-6)

    # Ragged case exercising the in-kernel batch + sample masks (no padding):
    # N=3, C=3, M=143 with a deliberately tiny tile budget -> GN=2, GM=2.
    x2 = jax.random.uniform(kx2, (3, 3, 13, 11), dtype=jnp.float32)
    y2 = (jax.random.uniform(ky2, (3, 3, 13, 11)) > 0.5).astype(jnp.float32)
    loss2 = jax.block_until_ready(
        sorensen_dice_loss(x2, y2, target_tile_bytes=4096))
    assert jnp.allclose(loss2, _reference_dice(x2, y2), rtol=1e-5, atol=1e-6)

    print("KERNEL_OK")
</pallas_src>

<mosaic_0001>
module attributes {stable_mosaic.version = 11 : i64} {
  func.func @kernel(%arg0: i32, %arg1: i32, %arg2: memref<2x4x256xf32, #tpu.memory_space<vmem>>, %arg3: memref<2x4x256xf32, #tpu.memory_space<vmem>>, %arg4: memref<1x4x128xf32, #tpu.memory_space<vmem>>, %arg5: memref<1x4x128xf32, #tpu.memory_space<vmem>>, %arg6: memref<1x4x128xf32, #tpu.memory_space<vmem>>) attributes {dimension_semantics = [#tpu.dimension_semantics<parallel>, #tpu.dimension_semantics<arbitrary>], iteration_bounds = array<i64: 1, 1>, scalar_prefetch = 0 : i64, scratch_operands = 0 : i64, tpu.core_type = #tpu.core_type<tc>, window_params = [{transform_indices = @transform_0, window_bounds = array<i64: 2, 4, 256>}, {transform_indices = @transform_1, window_bounds = array<i64: 2, 4, 256>}, {transform_indices = @transform_2, window_bounds = array<i64: 1, 4, 128>}, {transform_indices = @transform_3, window_bounds = array<i64: 1, 4, 128>}, {transform_indices = @transform_4, window_bounds = array<i64: 1, 4, 128>}]} {
    %c0_i32 = arith.constant 0 : i32
    %0 = arith.cmpi eq, %arg1, %c0_i32 : i32
    %1 = arith.extui %0 : i1 to i32
    %c0_i32_0 = arith.constant 0 : i32
    %2 = arith.cmpi ne, %1, %c0_i32_0 : i32
    scf.if %2 {
      %cst_37 = arith.constant 0.000000e+00 : f32
      %43 = vector.broadcast %cst_37 : f32 to vector<1x4x128xf32>
      %c0_38 = arith.constant 0 : index
      %c0_39 = arith.constant 0 : index
      %c0_40 = arith.constant 0 : index
      %44 = vector.load %arg4[%c0_38, %c0_39, %c0_40] : memref<1x4x128xf32, #tpu.memory_space<vmem>>, vector<1x4x128xf32>
      tpu.vector_store %arg4[%c0_38, %c0_39, %c0_40], %43 {strides = array<i32>} : memref<1x4x128xf32, #tpu.memory_space<vmem>>, vector<1x4x128xf32>,
      %cst_41 = arith.constant 0.000000e+00 : f32
      %45 = vector.broadcast %cst_41 : f32 to vector<1x4x128xf32>
      %c0_42 = arith.constant 0 : index
      %c0_43 = arith.constant 0 : index
      %c0_44 = arith.constant 0 : index
      %46 = vector.load %arg5[%c0_42, %c0_43, %c0_44] : memref<1x4x128xf32, #tpu.memory_space<vmem>>, vector<1x4x128xf32>
      tpu.vector_store %arg5[%c0_42, %c0_43, %c0_44], %45 {strides = array<i32>} : memref<1x4x128xf32, #tpu.memory_space<vmem>>, vector<1x4x128xf32>,
      %cst_45 = arith.constant 0.000000e+00 : f32
      %47 = vector.broadcast %cst_45 : f32 to vector<1x4x128xf32>
      %c0_46 = arith.constant 0 : index
      %c0_47 = arith.constant 0 : index
      %c0_48 = arith.constant 0 : index
      %48 = vector.load %arg6[%c0_46, %c0_47, %c0_48] : memref<1x4x128xf32, #tpu.memory_space<vmem>>, vector<1x4x128xf32>
      tpu.vector_store %arg6[%c0_46, %c0_47, %c0_48], %47 {strides = array<i32>} : memref<1x4x128xf32, #tpu.memory_space<vmem>>, vector<1x4x128xf32>,
    } else {
    }
    %cst = arith.constant 0.000000e+00 : f32
    %3 = vector.broadcast %cst : f32 to vector<1x4x128xf32>
    %cst_1 = arith.constant 0.000000e+00 : f32
    %4 = vector.broadcast %cst_1 : f32 to vector<1x4x128xf32>
    %cst_2 = arith.constant 0.000000e+00 : f32
    %5 = vector.broadcast %cst_2 : f32 to vector<1x4x128xf32>
    %c0 = arith.constant 0 : index
    %c0_3 = arith.constant 0 : index
    %c0_4 = arith.constant 0 : index
    %6 = vector.load %arg2[%c0, %c0_3, %c0_4] : memref<2x4x256xf32, #tpu.memory_space<vmem>>, vector<2x4x128xf32>
    %c0_5 = arith.constant 0 : index
    %c0_6 = arith.constant 0 : index
    %c0_7 = arith.constant 0 : index
    %7 = vector.load %arg3[%c0_5, %c0_6, %c0_7] : memref<2x4x256xf32, #tpu.memory_space<vmem>>, vector<2x4x128xf32>
    %8 = arith.mulf %6, %7 : vector<2x4x128xf32>
    %cst_8 = arith.constant dense<0.000000e+00> : vector<4x128xf32>
    %9 = vector.multi_reduction <add>, %8, %cst_8 [0] : vector<2x4x128xf32> to vector<4x128xf32>
    %10 = vector.shape_cast %9 : vector<4x128xf32> to vector<1x4x128xf32>
    %11 = arith.addf %3, %10 : vector<1x4x128xf32>
    %12 = arith.mulf %6, %6 : vector<2x4x128xf32>
    %cst_9 = arith.constant dense<0.000000e+00> : vector<4x128xf32>
    %13 = vector.multi_reduction <add>, %12, %cst_9 [0] : vector<2x4x128xf32> to vector<4x128xf32>
    %14 = vector.shape_cast %13 : vector<4x128xf32> to vector<1x4x128xf32>
    %15 = arith.addf %4, %14 : vector<1x4x128xf32>
    %16 = arith.mulf %7, %7 : vector<2x4x128xf32>
    %cst_10 = arith.constant dense<0.000000e+00> : vector<4x128xf32>
    %17 = vector.multi_reduction <add>, %16, %cst_10 [0] : vector<2x4x128xf32> to vector<4x128xf32>
    %18 = vector.shape_cast %17 : vector<4x128xf32> to vector<1x4x128xf32>
    %19 = arith.addf %5, %18 : vector<1x4x128xf32>
    %c0_11 = arith.constant 0 : index
    %c0_12 = arith.constant 0 : index
    %c128 = arith.constant 128 : index
    %20 = vector.load %arg2[%c0_11, %c0_12, %c128] : memref<2x4x256xf32, #tpu.memory_space<vmem>>, vector<2x4x128xf32>
    %c0_13 = arith.constant 0 : index
    %c0_14 = arith.constant 0 : index
    %c128_15 = arith.constant 128 : index
    %21 = vector.load %arg3[%c0_13, %c0_14, %c128_15] : memref<2x4x256xf32, #tpu.memory_space<vmem>>, vector<2x4x128xf32>
    %22 = arith.mulf %20, %21 : vector<2x4x128xf32>
    %cst_16 = arith.constant dense<0.000000e+00> : vector<4x128xf32>
    %23 = vector.multi_reduction <add>, %22, %cst_16 [0] : vector<2x4x128xf32> to vector<4x128xf32>
    %24 = vector.shape_cast %23 : vector<4x128xf32> to vector<1x4x128xf32>
    %25 = arith.addf %11, %24 : vector<1x4x128xf32>
    %26 = arith.mulf %20, %20 : vector<2x4x128xf32>
    %cst_17 = arith.constant dense<0.000000e+00> : vector<4x128xf32>
    %27 = vector.multi_reduction <add>, %26, %cst_17 [0] : vector<2x4x128xf32> to vector<4x128xf32>
    %28 = vector.shape_cast %27 : vector<4x128xf32> to vector<1x4x128xf32>
    %29 = arith.addf %15, %28 : vector<1x4x128xf32>
    %30 = arith.mulf %21, %21 : vector<2x4x128xf32>
    %cst_18 = arith.constant dense<0.000000e+00> : vector<4x128xf32>
    %31 = vector.multi_reduction <add>, %30, %cst_18 [0] : vector<2x4x128xf32> to vector<4x128xf32>
    %32 = vector.shape_cast %31 : vector<4x128xf32> to vector<1x4x128xf32>
    %33 = arith.addf %19, %32 : vector<1x4x128xf32>
    %c0_19 = arith.constant 0 : index
    %c0_20 = arith.constant 0 : index
    %c0_21 = arith.constant 0 : index
    %34 = vector.load %arg4[%c0_19, %c0_20, %c0_21] : memref<1x4x128xf32, #tpu.memory_space<vmem>>, vector<1x4x128xf32>
    %35 = arith.addf %34, %25 : vector<1x4x128xf32>
    %c0_22 = arith.constant 0 : index
    %c0_23 = arith.constant 0 : index
    %c0_24 = arith.constant 0 : index
    %36 = vector.load %arg4[%c0_22, %c0_23, %c0_24] : memref<1x4x128xf32, #tpu.memory_space<vmem>>, vector<1x4x128xf32>
    tpu.vector_store %arg4[%c0_22, %c0_23, %c0_24], %35 {strides = array<i32>} : memref<1x4x128xf32, #tpu.memory_space<vmem>>, vector<1x4x128xf32>,
    %c0_25 = arith.constant 0 : index
    %c0_26 = arith.constant 0 : index
    %c0_27 = arith.constant 0 : index
    %37 = vector.load %arg5[%c0_25, %c0_26, %c0_27] : memref<1x4x128xf32, #tpu.memory_space<vmem>>, vector<1x4x128xf32>
    %38 = arith.addf %37, %29 : vector<1x4x128xf32>
    %c0_28 = arith.constant 0 : index
    %c0_29 = arith.constant 0 : index
    %c0_30 = arith.constant 0 : index
    %39 = vector.load %arg5[%c0_28, %c0_29, %c0_30] : memref<1x4x128xf32, #tpu.memory_space<vmem>>, vector<1x4x128xf32>
    tpu.vector_store %arg5[%c0_28, %c0_29, %c0_30], %38 {strides = array<i32>} : memref<1x4x128xf32, #tpu.memory_space<vmem>>, vector<1x4x128xf32>,
    %c0_31 = arith.constant 0 : index
    %c0_32 = arith.constant 0 : index
    %c0_33 = arith.constant 0 : index
    %40 = vector.load %arg6[%c0_31, %c0_32, %c0_33] : memref<1x4x128xf32, #tpu.memory_space<vmem>>, vector<1x4x128xf32>
    %41 = arith.addf %40, %33 : vector<1x4x128xf32>
    %c0_34 = arith.constant 0 : index
    %c0_35 = arith.constant 0 : index
    %c0_36 = arith.constant 0 : index
    %42 = vector.load %arg6[%c0_34, %c0_35, %c0_36] : memref<1x4x128xf32, #tpu.memory_space<vmem>>, vector<1x4x128xf32>
    tpu.vector_store %arg6[%c0_34, %c0_35, %c0_36], %41 {strides = array<i32>} : memref<1x4x128xf32, #tpu.memory_space<vmem>>, vector<1x4x128xf32>,
    return
  }
  func.func @transform_0(%arg0: i32, %arg1: i32) -> (i32, i32, i32) {
    %c0_i32 = arith.constant 0 : i32
    %c0_i32_0 = arith.constant 0 : i32
    return %arg0, %c0_i32, %arg1 : i32, i32, i32
  }
  func.func @transform_1(%arg0: i32, %arg1: i32) -> (i32, i32, i32) {
    %c0_i32 = arith.constant 0 : i32
    %c0_i32_0 = arith.constant 0 : i32
    return %arg0, %c0_i32, %arg1 : i32, i32, i32
  }
  func.func @transform_2(%arg0: i32, %arg1: i32) -> (i32, i32, i32) {
    %c0_i32 = arith.constant 0 : i32
    %c0_i32_0 = arith.constant 0 : i32
    %c0_i32_1 = arith.constant 0 : i32
    return %arg0, %c0_i32, %c0_i32_0 : i32, i32, i32
  }
  func.func @transform_3(%arg0: i32, %arg1: i32) -> (i32, i32, i32) {
    %c0_i32 = arith.constant 0 : i32
    %c0_i32_0 = arith.constant 0 : i32
    %c0_i32_1 = arith.constant 0 : i32
    return %arg0, %c0_i32, %c0_i32_0 : i32, i32, i32
  }
  func.func @transform_4(%arg0: i32, %arg1: i32) -> (i32, i32, i32) {
    %c0_i32 = arith.constant 0 : i32
    %c0_i32_0 = arith.constant 0 : i32
    %c0_i32_1 = arith.constant 0 : i32
    return %arg0, %c0_i32, %c0_i32_0 : i32, i32, i32
  }
}

</mosaic_0001>

<bundles_post_ra>
// kernel: tpu_custom_call.1
= control target key start
LH: loop header
LB: loop body
LE: loop exit
PB: predicated region body
PF: predicated region fallthrough
CT: control target
= control target key end

     0   :  { %10 = vsyncpa [#allocation3], 0  ;;  %s386_s0 = inlined_call_operand.hbm [shape: f32[2,4,256], index: 0, kind: input, shape index: {}]   ;;  %s387_s1 = inlined_call_operand.hbm [shape: f32[2,4,256], index: 1, kind: input, shape index: {}]   ;;  %s388_s2 = inlined_call_operand.hbm [shape: f32[1,4,128], index: 2, kind: output, shape index: {0}]   ;;  %s389_s3 = inlined_call_operand.hbm [shape: f32[1,4,128], index: 3, kind: output, shape index: {1}]   ;;  %s390_s4 = inlined_call_operand.hbm [shape: f32[1,4,128], index: 4, kind: output, shape index: {2}]  }
   0x1   :  { %11 = vsyncpa [#allocation6], 0 }
   0x2   :  { %12 = vsyncpa [#allocation4], 0 }
   0x3   :  { %13 = vsyncpa [#allocation9], 0  ;;  %s274_s15 = smov [#allocation2]   ;;  %s156_s19 = scalar_lea.hbm %s386_s0, 256 }
   0x4   :  { %s19_s16 = sshll.u32 %s274_s15, 4  ;;  %p157_p0 = scmp.ne.s32.totalorder %s386_s0, %s156_s19  ;;  %s20_s16 = int_to_ptr.vmem [resolvable:$true] %s19_s16 }
   0x5   :  { %p160_p1 = scmp.lt.u32.totalorder %s156_s19, %s386_s0 }
   0x7   :  { %p162_p2 = pnand %p160_p1, %p157_p0 }
   0x9   :  { %165 = shalt.err (!%p162_p2)
}
   0xa   :  { %s166_s24 = scalar_lea.vmem %s20_s16, 256  ;;  %p171_p4 = scmp.lt.s32.totalorder %s20_s16, %s20_s16 }
   0xb   :  { %p167_p3 = scmp.ne.s32.totalorder %s20_s16, %s166_s24  ;;  %p172_p5 = scmp.lt.s32.totalorder %s166_s24, %s166_s24 }
   0xd   :  { %p173_p6 = por %p172_p5, %p171_p4 }
   0xf   :  { %p174_p7 = pnand %p173_p6, %p167_p3 }
  0x11   :  { %177 = shalt.err (!%p174_p7)
}
  0x12   :  { %s275_s25 = smov 128   ;;  %s276_s26 = smov 8  }
  0x13   :  { %25 = dma.hbm_to_vmem [thread:$0]  %s386_s0, 256, %s20_s16, [#allocation3], %s275_s25, %s275_s25, %s276_s26  }
  0x14   :  { %s277_s29 = smov [#allocation5]   ;;  %s178_s7 = scalar_lea.hbm %s387_s1, 256 }
  0x15   :  { %s31_s30 = sshll.u32 %s277_s29, 4  ;;  %p179_p8 = scmp.ne.s32.totalorder %s387_s1, %s178_s7  ;;  %s32_s30 = int_to_ptr.vmem [resolvable:$true] %s31_s30 }
  0x16   :  { %p182_p9 = scmp.lt.u32.totalorder %s178_s7, %s387_s1 }
  0x18   :  { %p184_p10 = pnand %p182_p9, %p179_p8 }
  0x1a   :  { %187 = shalt.err (!%p184_p10)
}
  0x1b   :  { %s188_s12 = scalar_lea.vmem %s32_s30, 256  ;;  %p193_p12 = scmp.lt.s32.totalorder %s32_s30, %s32_s30 }
  0x1c   :  { %p189_p11 = scmp.ne.s32.totalorder %s32_s30, %s188_s12  ;;  %p194_p13 = scmp.lt.s32.totalorder %s188_s12, %s188_s12 }
  0x1e   :  { %p195_p0 = por %p194_p13, %p193_p12 }
  0x20   :  { %p196_p1 = pnand %p195_p0, %p189_p11 }
  0x22   :  { %199 = shalt.err (!%p196_p1)
}
  0x23   :  { %37 = dma.hbm_to_vmem [thread:$0]  %s387_s1, 256, %s32_s30, [#allocation6], %s275_s25, %s275_s25, %s276_s26  }
  0x24   :  { %266 = dma.done.wait [#allocation3], 256  }
  0x25   :  { %267 = vsyncadd [#allocation3], 4294967040 }
  0x26   :  { %268 = dma.done.wait [#allocation6], 256  }
  0x27   :  { %269 = vsyncadd [#allocation6], 4294967040  ;;  %v278_v0 = vmov 0.0   ;;  %vm57_vm0 = vcmask 1043456   ;;  %v51_v1 = vld [vmem:[#allocation2] sm:$0xf] }
  0x28   :  { %49 = vst [vmem:[#allocation8] sm:$0xf] %v278_v0  ;;  %48 = vst [vmem:[#allocation7] sm:$0xf] %v278_v0  ;;  %v52_v2 = vld [vmem:[#allocation2 + $0x8] sm:$0xf]  ;;  %v62_v4 = vmul.f32 %v51_v1, %v51_v1 }
  0x29   :  { %50 = vst [vmem:[#allocation10] sm:$0xf] %v278_v0  ;;  %v74_v3 = vld [vmem:[#allocation2 + $0x4] sm:$0xf]  ;;  %v63_v5 = vmul.f32 %v52_v2, %v52_v2  ;;  %v75_v6 = vld [vmem:[#allocation2 + $0xc] sm:$0xf] }
  0x2a   :  { %v84_v7 = vmul.f32 %v74_v3, %v74_v3  ;;  %v53_v8 = vld [vmem:[#allocation5] sm:$0xf]  ;;  %v85_v9 = vmul.f32 %v75_v6, %v75_v6  ;;  %v54_v10 = vld [vmem:[#allocation5 + $0x8] sm:$0xf]  ;;  %v76_v12 = vld [vmem:[#allocation5 + $0x4] sm:$0xf] }
  0x2b   :  { %v55_v11 = vmul.f32 %v53_v8, %v51_v1  ;;  %v77_v13 = vld [vmem:[#allocation5 + $0xc] sm:$0xf]  ;;  %v68_v14 = vmul.f32 %v53_v8, %v53_v8  ;;  %v64_v15 = vsel %vm57_vm0, %v62_v4, 0.0  ;;  %v65_v16 = vsel %vm57_vm0, %v63_v5, 0.0  ;;  %s279_s1 = smov [#allocation8]   ;;  %s280_s15 = smov [#allocation7]  }
  0x2c   :  { %v86_v17 = vsel %vm57_vm0, %v84_v7, 0.0  ;;  %v56_v18 = vmul.f32 %v54_v10, %v52_v2  ;;  %v66_v19 = vadd.f32 %v65_v16, %v64_v15  ;;  %v87_v20 = vsel %vm57_vm0, %v85_v9, 0.0  ;;  %s121_s14 = sshll.u32 %s279_s1, 4  ;;  %s111_s16 = sshll.u32 %s280_s15, 4  ;;  %s122_s14 = int_to_ptr.vmem [resolvable:$true] %s121_s14  ;;  %s343_s16 = int_to_ptr.vmem [resolvable:$true] %s111_s16 }
  0x2d   :  { %v58_v21 = vsel %vm57_vm0, %v55_v11, 0.0  ;;  %v78_v22 = vmul.f32 %v76_v12, %v74_v3  ;;  %v88_v23 = vadd.f32 %v87_v20, %v86_v17  ;;  %v79_v25 = vmul.f32 %v77_v13, %v75_v6  ;;  %s281_s17 = smov [#allocation10]   ;;  %s200_s19 = scalar_lea.vmem %s122_s14, 64 }
  0x2e   :  { %v59_v24 = vsel %vm57_vm0, %v56_v18, 0.0  ;;  %v69_v26 = vmul.f32 %v54_v10, %v54_v10  ;;  %v70_v30 = vsel %vm57_vm0, %v68_v14, 0.0  ;;  %v90_v31 = vmul.f32 %v76_v12, %v76_v12  ;;  %s131_s18 = sshll.u32 %s281_s17, 4  ;;  %p201_p2 = scmp.ne.s32.totalorder %s122_s14, %s200_s19  ;;  %s132_s18 = int_to_ptr.vmem [resolvable:$true] %s131_s18 }
  0x2f   :  { %v99_v27 = vld [vmem:[#allocation8] sm:$0xf]  ;;  %v60_v28 = vadd.f32 %v59_v24, %v58_v21  ;;  %v80_v29 = vsel %vm57_vm0, %v78_v22, 0.0  ;;  %v89_v32 = vadd.f32 %v88_v23, %v66_v19  ;;  %v81_v33 = vsel %vm57_vm0, %v79_v25, 0.0  ;;  %v96_v40 = vld [vmem:[#allocation7] sm:$0xf]  ;;  %p205_p3 = scmp.lt.s32.totalorder %s122_s14, %s122_s14  ;;  %p206_p4 = scmp.lt.s32.totalorder %s200_s19, %s200_s19 }
  0x30   :  { %v71_v34 = vsel %vm57_vm0, %v69_v26, 0.0  ;;  %v91_v35 = vmul.f32 %v77_v13, %v77_v13  ;;  %v82_v36 = vadd.f32 %v81_v33, %v80_v29  ;;  %v92_v38 = vsel %vm57_vm0, %v90_v31, 0.0  ;;  %v102_v44 = vld [vmem:[#allocation10] sm:$0xf] }
  0x31   :  { %v72_v37 = vadd.f32 %v71_v34, %v70_v30  ;;  %v100_v39 = vadd.f32 %v99_v27, %v89_v32  ;;  %p207_p5 = por %p206_p4, %p205_p3 }
  0x32   :  { %v93_v41 = vsel %vm57_vm0, %v91_v35, 0.0  ;;  %v83_v42 = vadd.f32 %v82_v36, %v60_v28 }
  0x33   :  { %v94_v43 = vadd.f32 %v93_v41, %v92_v38  ;;  %101 = vst [vmem:[#allocation8] sm:$0xf] %v100_v39  ;;  %p208_p6 = pnand %p207_p5, %p201_p2 }
  0x34   :  { %v97_v45 = vadd.f32 %v96_v40, %v83_v42 }
  0x35   :  { %v95_v46 = vadd.f32 %v94_v43, %v72_v37 }
  0x36   :  { %211 = shalt.err (!%p208_p6)
}
  0x37   :  { %s212_s22 = scalar_lea.hbm %s389_s3, 64 }
  0x38   :  { %p213_p7 = scmp.ne.s32.totalorder %s389_s3, %s212_s22  ;;  %p216_p8 = scmp.lt.u32.totalorder %s212_s22, %s389_s3 }
  0x3a   :  { %p218_p9 = pnand %p216_p8, %p213_p7 }
  0x3c   :  { %221 = shalt.err (!%p218_p9)
}
  0x3d   :  { %124 = dma.vmem_to_hbm [thread:$0]  %s122_s14, 64, %s389_s3, [#allocation9]   ;;  %98 = vst [vmem:[#allocation7] sm:$0xf] %v97_v45  ;;  %v103_v47 = vadd.f32 %v102_v44, %v95_v46 }
  0x3e   :  { %s222_s29 = scalar_lea.vmem %s343_s16, 64  ;;  %p227_p11 = scmp.lt.s32.totalorder %s343_s16, %s343_s16 }
  0x3f   :  { %p223_p10 = scmp.ne.s32.totalorder %s343_s16, %s222_s29  ;;  %p228_p12 = scmp.lt.s32.totalorder %s222_s29, %s222_s29 }
  0x41   :  { %p229_p13 = por %p228_p12, %p227_p11 }
  0x43   :  { %p230_p0 = pnand %p229_p13, %p223_p10 }
  0x45   :  { %233 = shalt.err (!%p230_p0)
}
  0x46   :  { %s234_s6 = scalar_lea.hbm %s388_s2, 64 }
  0x47   :  { %p235_p1 = scmp.ne.s32.totalorder %s388_s2, %s234_s6  ;;  %p238_p2 = scmp.lt.u32.totalorder %s234_s6, %s388_s2 }
  0x49   :  { %p240_p3 = pnand %p238_p2, %p235_p1 }
  0x4b   :  { %243 = shalt.err (!%p240_p3)
}
  0x4c   :  { %114 = dma.vmem_to_hbm [thread:$0]  %s343_s16, 64, %s388_s2, [#allocation4]   ;;  %104 = vst [vmem:[#allocation10] sm:$0xf] %v103_v47 }
  0x4d   :  { %s244_s12 = scalar_lea.vmem %s132_s18, 64  ;;  %p249_p5 = scmp.lt.s32.totalorder %s132_s18, %s132_s18 }
  0x4e   :  { %p245_p4 = scmp.ne.s32.totalorder %s132_s18, %s244_s12  ;;  %p250_p6 = scmp.lt.s32.totalorder %s244_s12, %s244_s12 }
  0x50   :  { %p251_p7 = por %p250_p6, %p249_p5 }
  0x52   :  { %p252_p8 = pnand %p251_p7, %p245_p4 }
  0x54   :  { %255 = shalt.err (!%p252_p8)
}
  0x55   :  { %s256_s1 = scalar_lea.hbm %s390_s4, 64 }
  0x56   :  { %p257_p9 = scmp.ne.s32.totalorder %s390_s4, %s256_s1  ;;  %p260_p10 = scmp.lt.u32.totalorder %s256_s1, %s390_s4 }
  0x58   :  { %p262_p11 = pnand %p260_p10, %p257_p9 }
  0x5a   :  { %265 = shalt.err (!%p262_p11)
}
  0x5b   :  { %134 = dma.vmem_to_hbm [thread:$0]  %s132_s18, 64, %s390_s4, [#allocation9]  }
  0x5c   :  { %270 = dma.done.wait [#allocation4], 64  }
  0x5d   :  { %271 = vsyncadd [#allocation4], 4294967232 }
  0x5e   :  { %272 = dma.done.wait [#allocation9], 128  }
  0x5f   :  { %273 = vsyncadd [#allocation9], 4294967168 }
  0x60   :  { %144 = vsyncpa [#allocation3], 1 }
  0x61   :  { %145 = vsyncpa [#allocation6], 1 }
  0x62   :  { %146 = vsyncpa [#allocation4], 1 }
  0x63   :  { %147 = vsyncpa [#allocation9], 1 }

</bundles_post_ra>
